<compile_context>
chip_gen: v7x
topology: tpu7x:2x2x1
jax: 0.10.0
libtpu: 0.0.40
codegen_flags: <defaults>
</compile_context>

<pallas_src>
import numpy as np
import jax
import jax.numpy as jnp
from jax.experimental import pallas as pl
from jax.experimental.pallas import tpu as pltpu


# ----------------------------- Pallas kernel ------------------------------- #
def physnet_residual_kernel(x_ref, w1_ref, b1_ref, w2_ref, b2_ref, o_ref):
    # Stable softplus: identical to jax.nn.softplus / torch.nn.Softplus.
    def softplus(v):
        return jnp.maximum(v, 0.0) + jnp.log1p(jnp.exp(-jnp.abs(v)))

    x = x_ref[...]                                               # [TM, F] f32

    h = softplus(x)                                              # preactivation
    # Dense1 + act: bf16 operands into the MXU, f32 accumulation.
    h = jnp.dot(h.astype(jnp.bfloat16), w1_ref[...],
                preferred_element_type=jnp.float32) + b1_ref[...]
    h = softplus(h)
    # Dense2 (no activation).
    h = jnp.dot(h.astype(jnp.bfloat16), w2_ref[...],
                preferred_element_type=jnp.float32) + b2_ref[...]

    o_ref[...] = (x + h).astype(o_ref.dtype)                     # residual add


# ------------------------------- helpers ------------------------------------ #
def _pick_row_tile(n_rows, row_block):
    """Largest tile <= row_block that divides n_rows, is a multiple of the
    8-sublane granule (or equals n_rows), and leaves >= 2 grid steps whenever
    n_rows allows it (so v7x megacore can split the 'parallel' axis)."""
    cap = min(row_block, n_rows)
    if n_rows >= 16:
        cap = min(cap, n_rows // 2)          # keep at least 2 grid steps
    for t in range(cap, 0, -1):
        if n_rows % t == 0 and (t % 8 == 0 or t == n_rows):
            return t
    return n_rows                             # degenerate fallback: single step


# ------------------------------- wrapper ------------------------------------ #
def physnet_residual(x, w1_t, b1, w2_t, b2, *, row_block=512):
    """x: [N, F] f32; w*_t: [F, F] already transposed to [in, out] (any float
    dtype, converted to bf16 here); b*: [1, F] f32."""
    N, F = x.shape
    assert F % 128 == 0, "pad per-atom features to a multiple of 128 lanes"
    # TODO(synk): if the caller pads N to tile evenly, padded zero rows produce
    # nonzero outputs (softplus(0) feeds the dense path) and must be sliced off.
    tm = _pick_row_tile(N, row_block)
    assert N % tm == 0
    grid = (N // tm,)

    # bf16 weights for the MXU (native bf16 on v5e/v6e/v7x); f32 biases.
    w1_bf16 = w1_t.astype(jnp.bfloat16)
    w2_bf16 = w2_t.astype(jnp.bfloat16)
    b1 = b1.astype(jnp.float32)
    b2 = b2.astype(jnp.float32)

    cost = pl.CostEstimate(
        flops=4 * N * F * F + 6 * N * F,          # 2 matmuls + elementwise
        transcendentals=4 * N * F,                # 2 softplus (exp + log1p each)
        bytes_accessed=2 * N * F * 4              # x in + out (f32)
        + 2 * F * F * 2                           # W1 + W2 (bf16)
        + 2 * F * 4,                              # biases (f32)
    )

    # Honest VMEM budget: double-buffered x/out tiles (f32), single-buffered
    # bf16 weights + f32 biases, plus generous slack for in-kernel temporaries.
    vmem_bytes = (
        4 * tm * F * 4            # x + out tiles, 2 buffers each, f32
        + 2 * F * F * 2           # W1 + W2, bf16, single-buffered
        + 2 * F * 4               # biases
        + 6 * tm * F * 4          # softplus / matmul / cast temporaries
    )
    vmem_limit = int(vmem_bytes * 2) + (1 << 20)

    weight_spec = lambda: pl.BlockSpec((F, F), lambda i: (0, 0),
                                       pipeline_mode=pl.Buffered(1))
    bias_spec = lambda: pl.BlockSpec((1, F), lambda i: (0, 0),
                                     pipeline_mode=pl.Buffered(1))

    return pl.pallas_call(
        physnet_residual_kernel,
        out_shape=jax.ShapeDtypeStruct((N, F), x.dtype),
        grid_spec=pltpu.PrefetchScalarGridSpec(
            num_scalar_prefetch=0,
            grid=grid,
            in_specs=[
                pl.BlockSpec((tm, F), lambda i: (i, 0)),   # x row tile
                weight_spec(),                              # W1 (resident, bf16)
                bias_spec(),                                # b1
                weight_spec(),                              # W2 (resident, bf16)
                bias_spec(),                                # b2
            ],
            out_specs=pl.BlockSpec((tm, F), lambda i: (i, 0)),
        ),
        compiler_params=pltpu.CompilerParams(
            dimension_semantics=("parallel",),              # megacore on v7x
            vmem_limit_bytes=vmem_limit,
        ),
        cost_estimate=cost,
    )(x, w1_bf16, b1, w2_bf16, b2)


# ---------------------------- pure-JAX reference ----------------------------- #
def ref_forward(x, w1_t, b1, w2_t, b2):
    act = jax.nn.softplus
    h = act(x)
    h = act(h @ w1_t + b1)
    h = h @ w2_t + b2
    return x + h


# --------------------------------- main -------------------------------------- #
if __name__ == "__main__":
    # Small but lane-dense shapes consistent with the module:
    # N atoms on the sublane/row axis, F=128 per-atom features on the lanes
    # (PhysNet's default feature width is 128, already a lane multiple).
    N_ATOMS = 256
    F = 128

    key = jax.random.PRNGKey(0)
    keys = jax.random.split(key, 8)

    x = jax.random.normal(keys[0], (N_ATOMS, F), jnp.float32)

    s = 0.1
    # torch nn.Linear layout [out, in]; transposed once below (glue).
    w1 = s * jax.random.normal(keys[1], (F, F), jnp.float32)
    b1 = s * jax.random.normal(keys[2], (F,), jnp.float32)
    w2 = s * jax.random.normal(keys[3], (F, F), jnp.float32)
    b2 = s * jax.random.normal(keys[4], (F,), jnp.float32)

    w1_t, w2_t = w1.T, w2.T
    b1_r, b2_r = b1.reshape(1, F), b2.reshape(1, F)

    out = physnet_residual(x, w1_t, b1_r, w2_t, b2_r)
    out = jax.block_until_ready(out)
    assert out.shape == (N_ATOMS, F)

    # Check against the reference evaluated with the same bf16-quantized
    # weights (isolates kernel correctness from weight quantization) ...
    ref_q = ref_forward(x,
                        w1_t.astype(jnp.bfloat16).astype(jnp.float32), b1_r,
                        w2_t.astype(jnp.bfloat16).astype(jnp.float32), b2_r)
    assert np.allclose(np.asarray(out), np.asarray(ref_q), rtol=2e-2, atol=2e-2)

    # ... and loosely against the full-f32 torch-equivalent reference
    # (bf16 matmul operands -> ~1e-2 level differences expected).
    ref = ref_forward(x, w1_t, b1_r, w2_t, b2_r)
    assert np.allclose(np.asarray(out), np.asarray(ref), rtol=5e-2, atol=5e-2)

    print("KERNEL_OK")
</pallas_src>

<mosaic_0001>
module attributes {stable_mosaic.version = 11 : i64} {
  func.func @physnet_residual_kernel(%arg0: i32, %arg1: memref<128x128xf32, #tpu.memory_space<vmem>>, %arg2: memref<128x128xbf16, #tpu.memory_space<vmem>>, %arg3: memref<1x128xf32, #tpu.memory_space<vmem>>, %arg4: memref<128x128xbf16, #tpu.memory_space<vmem>>, %arg5: memref<1x128xf32, #tpu.memory_space<vmem>>, %arg6: memref<128x128xf32, #tpu.memory_space<vmem>>) attributes {dimension_semantics = [#tpu.dimension_semantics<parallel>], iteration_bounds = array<i64: 2>, scalar_prefetch = 0 : i64, scratch_operands = 0 : i64, tpu.core_type = #tpu.core_type<tc>, window_params = [{transform_indices = @transform_0, window_bounds = array<i64: 128, 128>}, {pipeline_mode = #tpu.pipeline_mode<synchronous>, transform_indices = @transform_1, window_bounds = array<i64: 128, 128>}, {pipeline_mode = #tpu.pipeline_mode<synchronous>, transform_indices = @transform_2, window_bounds = array<i64: 1, 128>}, {pipeline_mode = #tpu.pipeline_mode<synchronous>, transform_indices = @transform_3, window_bounds = array<i64: 128, 128>}, {pipeline_mode = #tpu.pipeline_mode<synchronous>, transform_indices = @transform_4, window_bounds = array<i64: 1, 128>}, {transform_indices = @transform_5, window_bounds = array<i64: 128, 128>}]} {
    %c0 = arith.constant 0 : index
    %c0_0 = arith.constant 0 : index
    %0 = vector.load %arg1[%c0, %c0_0] : memref<128x128xf32, #tpu.memory_space<vmem>>, vector<128x128xf32>
    %cst = arith.constant 0.000000e+00 : f32
    %1 = vector.broadcast %cst : f32 to vector<128x128xf32>
    %2 = arith.maximumf %0, %1 : vector<128x128xf32>
    %3 = math.absf %0 : vector<128x128xf32>
    %cst_1 = arith.constant 0.000000e+00 : f32
    %4 = vector.broadcast %cst_1 : f32 to vector<128x128xf32>
    %5 = arith.subf %4, %3 : vector<128x128xf32>
    %6 = math.exp %5 : vector<128x128xf32>
    %7 = math.log1p %6 : vector<128x128xf32>
    %8 = arith.addf %2, %7 : vector<128x128xf32>
    %9 = arith.truncf %8 : vector<128x128xf32> to vector<128x128xbf16>
    %c0_2 = arith.constant 0 : index
    %c0_3 = arith.constant 0 : index
    %10 = vector.load %arg2[%c0_2, %c0_3] : memref<128x128xbf16, #tpu.memory_space<vmem>>, vector<128x128xbf16>
    %cst_4 = arith.constant dense<0.000000e+00> : vector<128x128xf32>
    %11 = tpu.matmul %9, %10, %cst_4 {dimension_numbers = #tpu.dot_dimension_numbers<[1], [0], [0], [1], [0, 0, 1, 1], [], []>} : vector<128x128xbf16>, vector<128x128xbf16>, vector<128x128xf32> -> vector<128x128xf32>
    %c0_5 = arith.constant 0 : index
    %c0_6 = arith.constant 0 : index
    %12 = vector.load %arg3[%c0_5, %c0_6] : memref<1x128xf32, #tpu.memory_space<vmem>>, vector<1x128xf32>
    %13 = vector.broadcast %12 : vector<1x128xf32> to vector<128x128xf32>
    %14 = arith.addf %11, %13 : vector<128x128xf32>
    %cst_7 = arith.constant 0.000000e+00 : f32
    %15 = vector.broadcast %cst_7 : f32 to vector<128x128xf32>
    %16 = arith.maximumf %14, %15 : vector<128x128xf32>
    %17 = math.absf %14 : vector<128x128xf32>
    %cst_8 = arith.constant 0.000000e+00 : f32
    %18 = vector.broadcast %cst_8 : f32 to vector<128x128xf32>
    %19 = arith.subf %18, %17 : vector<128x128xf32>
    %20 = math.exp %19 : vector<128x128xf32>
    %21 = math.log1p %20 : vector<128x128xf32>
    %22 = arith.addf %16, %21 : vector<128x128xf32>
    %23 = arith.truncf %22 : vector<128x128xf32> to vector<128x128xbf16>
    %c0_9 = arith.constant 0 : index
    %c0_10 = arith.constant 0 : index
    %24 = vector.load %arg4[%c0_9, %c0_10] : memref<128x128xbf16, #tpu.memory_space<vmem>>, vector<128x128xbf16>
    %cst_11 = arith.constant dense<0.000000e+00> : vector<128x128xf32>
    %25 = tpu.matmul %23, %24, %cst_11 {dimension_numbers = #tpu.dot_dimension_numbers<[1], [0], [0], [1], [0, 0, 1, 1], [], []>} : vector<128x128xbf16>, vector<128x128xbf16>, vector<128x128xf32> -> vector<128x128xf32>
    %c0_12 = arith.constant 0 : index
    %c0_13 = arith.constant 0 : index
    %26 = vector.load %arg5[%c0_12, %c0_13] : memref<1x128xf32, #tpu.memory_space<vmem>>, vector<1x128xf32>
    %27 = vector.broadcast %26 : vector<1x128xf32> to vector<128x128xf32>
    %28 = arith.addf %25, %27 : vector<128x128xf32>
    %29 = arith.addf %0, %28 : vector<128x128xf32>
    %c0_14 = arith.constant 0 : index
    %c0_15 = arith.constant 0 : index
    %30 = vector.load %arg6[%c0_14, %c0_15] : memref<128x128xf32, #tpu.memory_space<vmem>>, vector<128x128xf32>
    tpu.vector_store %arg6[%c0_14, %c0_15], %29 {strides = array<i32>} : memref<128x128xf32, #tpu.memory_space<vmem>>, vector<128x128xf32>,
    return
  }
  func.func @transform_0(%arg0: i32) -> (i32, i32) {
    %c0_i32 = arith.constant 0 : i32
    %c0_i32_0 = arith.constant 0 : i32
    return %arg0, %c0_i32 : i32, i32
  }
  func.func @transform_1(%arg0: i32) -> (i32, i32) {
    %c0_i32 = arith.constant 0 : i32
    %c0_i32_0 = arith.constant 0 : i32
    %c0_i32_1 = arith.constant 0 : i32
    return %c0_i32, %c0_i32_0 : i32, i32
  }
  func.func @transform_2(%arg0: i32) -> (i32, i32) {
    %c0_i32 = arith.constant 0 : i32
    %c0_i32_0 = arith.constant 0 : i32
    %c0_i32_1 = arith.constant 0 : i32
    return %c0_i32, %c0_i32_0 : i32, i32
  }
  func.func @transform_3(%arg0: i32) -> (i32, i32) {
    %c0_i32 = arith.constant 0 : i32
    %c0_i32_0 = arith.constant 0 : i32
    %c0_i32_1 = arith.constant 0 : i32
    return %c0_i32, %c0_i32_0 : i32, i32
  }
  func.func @transform_4(%arg0: i32) -> (i32, i32) {
    %c0_i32 = arith.constant 0 : i32
    %c0_i32_0 = arith.constant 0 : i32
    %c0_i32_1 = arith.constant 0 : i32
    return %c0_i32, %c0_i32_0 : i32, i32
  }
  func.func @transform_5(%arg0: i32) -> (i32, i32) {
    %c0_i32 = arith.constant 0 : i32
    %c0_i32_0 = arith.constant 0 : i32
    return %arg0, %c0_i32 : i32, i32
  }
}

</mosaic_0001>

<bundles_post_ra>
// kernel: tpu_custom_call.1
= control target key start
LH: loop header
LB: loop body
LE: loop exit
PB: predicated region body
PF: predicated region fallthrough
CT: control target
= control target key end

     0   :  { %10 = vsyncpa [#allocation3], 0  ;;  %s2507_s0 = inlined_call_operand.hbm [shape: f32[256,128], index: 0, kind: input, shape index: {}]   ;;  %s2508_s1 = inlined_call_operand.hbm [shape: bf16[128,128], index: 1, kind: input, shape index: {}]   ;;  %s2509_s2 = inlined_call_operand.vmem [shape: f32[1,128], index: 2, kind: input, shape index: {}]   ;;  %s2510_s3 = inlined_call_operand.hbm [shape: bf16[128,128], index: 3, kind: input, shape index: {}]   ;;  %s2511_s4 = inlined_call_operand.vmem [shape: f32[1,128], index: 4, kind: input, shape index: {}]   ;;  %s2512_s5 = inlined_call_operand.hbm [shape: f32[256,128], index: 5, kind: output, shape index: {}]  }
   0x1   :  { %12 = vsyncpa [#allocation3 + $0x1], 0 }
   0x2   :  { %13 = vsyncpa [#allocation6], 0 }
   0x3   :  { %14 = vsyncpa [#allocation4], 0 }
   0x4   :  { %16 = vsyncpa [#allocation4 + $0x1], 0  ;;  %s1826_s18 = smov 0   ;;  %s1828_s19 = smov 0  }
   0x5   :  { %s1830_s20 = smov 0   ;;  %s1832_s21 = smov 0  }
   0x6 LB: > { %s1847_s22 = sadd.s32 4294967295, %s1784_s21   ;;  %s1261_s23 = sadd.s32 4294967294, %s1784_s21   ;;  %s1784_s21 = sphi %s1832_s21, %s2572_s21   ;;  %s1780_s20 = sphi %s1830_s20, %s2571_s20   ;;  %s1776_s19 = sphi %s1828_s19, %s2570_s19   ;;  %s1772_s18 = sphi %s1826_s18, %s2569_s18  }
   0x7   : > { %p42_p0 = scmp.ne.s32.totalorder %s1776_s19, %s1772_s18  ;;  %p2513_p1 = scmp.eq.s32.totalorder %s1847_s22, 0 }
   0x8   : > { %p156_p3 = scmp.eq.s32.totalorder %s1261_s23, 1  ;;  %p1262_p5 = scmp.ge.s32.totalorder %s1784_s21, 1 }
   0x9   : > { %p1856_p4 = por %p2513_p1, %p42_p0  ;;  %p163_p7 = scmp.lt.s32.totalorder %s1784_s21, 3 }
   0xa   : > { %p1861_p6 = por %p156_p3, %p42_p0  ;;  %s1786_s27 = smov [#allocation5]  }
   0xb   : > { %s2516_s24 = scalar_select %p1856_p4, 1, 0 }
   0xc   : > { %s2517_s25 = scalar_select %p1861_p6, 1, 0 }
   0xd   : > { %p1866_p8 = pnand %p1262_p5, %p163_p7  ;;  %s175_s28 = sshll.u32 %s1786_s27, 4  ;;  %s1870_s28 = int_to_ptr.vmem [resolvable:$true] %s175_s28 }
   0xe   : > { %s1787_s30 = smov [#allocation7]   ;;  %s1628_s9 = scalar_lea.hbm %s2508_s1, 1024 }
   0xf   : > { %p1407_p9 = pneg %p1866_p8  ;;  %s191_s6 = sshll.u32 %s1787_s30, 4  ;;  %s1881_s6 = int_to_ptr.vmem [resolvable:$true] %s191_s6 }
  0x10   : > { %p1629_p12 = scmp.ne.s32.totalorder %s2508_s1, %s1628_s9  ;;  %p1635_p5 = scmp.lt.u32.totalorder %s1628_s9, %s2508_s1 }
  0x11   : > { %p1877_p11 = pnand %p1407_p9, %p2513_p1 }
  0x13   : > { %p1630_p13 = pneg %p1877_p11 }
  0x15   : > { %p1631_p0 = pnand %p1630_p13, %p1629_p12 }
  0x17   : > { %p1632_p3 = pneg %p1631_p0 }
  0x19   : > { %p1637_p7 = pnand %p1635_p5, %p1632_p3 }
  0x1b   : > { %1640 = shalt.err (!%p1637_p7)
}
  0x1c   : > { %s1641_s14 = scalar_lea.vmem %s1870_s28, 1024  ;;  %p1649_p2 = scmp.lt.s32.totalorder %s1870_s28, %s1870_s28 }
  0x1d   : > { %p1642_p9 = scmp.ne.s32.totalorder %s1870_s28, %s1641_s14  ;;  %p1650_p12 = scmp.lt.s32.totalorder %s1641_s14, %s1641_s14 }
  0x1f   : > { %p1644_p10 = pnand %p1642_p9, %p1630_p13  ;;  %p1651_p0 = por %p1650_p12, %p1649_p2 }
  0x21   : > { %p1645_p1 = pneg %p1644_p10 }
  0x23   : > { %p1652_p6 = pnand %p1651_p0, %p1645_p1 }
  0x25   : > { %1655 = shalt.err (!%p1652_p6)
}
  0x26   : > { %s1788_s15 = smov 64   ;;  %s1789_s16 = smov 4  }
  0x27   : > { %1410 = dma.hbm_to_vmem [thread:$0]  (!%p1877_p11), %s2508_s1, 1024, %s1870_s28, [#allocation6], %s1788_s15, %s1788_s15, %s1789_s16  }
  0x28   : > { %s1656_s7 = scalar_lea.hbm %s2510_s3, 1024 }
  0x29   : > { %p1657_p2 = scmp.ne.s32.totalorder %s2510_s3, %s1656_s7  ;;  %p1663_p10 = scmp.lt.u32.totalorder %s1656_s7, %s2510_s3 }
  0x2b   : > { %p1659_p1 = pnand %p1657_p2, %p1630_p13 }
  0x2d   : > { %p1660_p6 = pneg %p1659_p1 }
  0x2f   : > { %p1665_p3 = pnand %p1663_p10, %p1660_p6 }
  0x31   : > { %1668 = shalt.err (!%p1665_p3)
}
  0x32   : > { %s1669_s28 = scalar_lea.vmem %s1881_s6, 1024  ;;  %p1677_p12 = scmp.lt.s32.totalorder %s1881_s6, %s1881_s6 }
  0x33   : > { %p1670_p5 = scmp.ne.s32.totalorder %s1881_s6, %s1669_s28  ;;  %p1678_p0 = scmp.lt.s32.totalorder %s1669_s28, %s1669_s28 }
  0x35   : > { %p1672_p7 = pnand %p1670_p5, %p1630_p13  ;;  %p1679_p2 = por %p1678_p0, %p1677_p12 }
  0x37   : > { %p1673_p9 = pneg %p1672_p7 }
  0x39   : > { %p1680_p1 = pnand %p1679_p2, %p1673_p9 }
  0x3b   : > { %1683 = shalt.err (!%p1680_p1)
}
  0x3c   : > { %1413 = dma.hbm_to_vmem [thread:$0]  (!%p1877_p11), %s2510_s3, 1024, %s1881_s6, [#allocation6], %s1788_s15, %s1788_s15, %s1789_s16  }
  0x3d   : > { %s1936_s14 = sadd.s32 1, %s1784_s21   ;;  %s29_s29 = sadd.s32 1, %s1780_s20 }
  0x3e   : > { %s26_s17 = ssub.s32 %s1784_s21, %s1936_s14  ;;  %p36_p13 = scmp.ne.s32.totalorder %s1780_s20, %s1776_s19 }
  0x3f   : > { %p27_p6 = scmp.eq.s32.totalorder %s26_s17, 0  ;;  %p37_p10 = scmp.eq.s32.totalorder %s1784_s21, 0 }
  0x40   : > { %p2520_p3 = scmp.eq.s32.totalorder %s1847_s22, 1  ;;  %p1424_p7 = scmp.lt.s32.totalorder %s1784_s21, 2 }
  0x41   : > { %s1952_s27 = scalar_select %p27_p6, %s1780_s20, %s29_s29  }
  0x42   : > { %p1946_p5 = por %p2520_p3, %p36_p13  ;;  %p38_p9 = por %p37_p10, %p36_p13 }
  0x43   : > { %s208_s30 = sand.u32 1, %s1780_s20   ;;  %s1297_s6 = sshll.u32 %s1784_s21, 11 }
  0x44   : > { %s2521_s23 = scalar_select %p1946_p5, 1, 0 }
  0x45   : > { %s1266_s7 = sshll.u32 %s208_s30, 7  ;;  %s1959_s8 = scalar_lea.hbm %s2507_s0, %s1297_s6 }
  0x46   : > { %s212_s9 = scalar_lea.vmem [#allocation2], %s1266_s7  ;;  %p1963_p11 = pnand %p1424_p7, %p38_p9 }
  0x47   : > { %s219_s10 = sshll.u32 %s212_s9, 4  ;;  %s1967_s28 = scalar_lea.sflag [#allocation3], %s208_s30  ;;  %s1961_s10 = int_to_ptr.vmem [resolvable:$true] %s219_s10 }
  0x48   : > { %s1684_s12 = scalar_lea.hbm %s1959_s8, 2048  ;;  %p1686_p0 = pneg %p1963_p11 }
  0x49   : > { %p1685_p12 = scmp.ne.s32.totalorder %s1959_s8, %s1684_s12  ;;  %s1689_s17 = scalar_lea.hbm %s2507_s0, 4096 }
  0x4a   : > { %p1690_p13 = scmp.lt.u32.totalorder %s1959_s8, %s2507_s0  ;;  %p1691_p6 = scmp.lt.u32.totalorder %s1689_s17, %s1684_s12 }
  0x4b   : > { %p1687_p2 = pnand %p1686_p0, %p1685_p12  ;;  %p1693_p3 = scmp.lt.u32.totalorder %s1684_s12, %s1959_s8 }
  0x4c   : > { %p1692_p10 = por %p1691_p6, %p1690_p13 }
  0x4d   : > { %p1688_p1 = pneg %p1687_p2 }
  0x4e   : > { %p1694_p7 = por %p1693_p3, %p1692_p10 }
  0x50   : > { %p1695_p9 = pnand %p1694_p7, %p1688_p1 }
  0x52   : > { %1698 = shalt.err (!%p1695_p9)
}
  0x53   : > { %s1699_s30 = scalar_lea.vmem %s1961_s10, 2048  ;;  %s1790_s15 = smov [#allocation2]  }
  0x54   : > { %p1700_p12 = scmp.ne.s32.totalorder %s1961_s10, %s1699_s30  ;;  %s1704_s16 = sshll.u32 %s1790_s15, 4  ;;  %s1705_s16 = int_to_ptr.vmem [resolvable:$false] %s1704_s16 }
  0x55   : > { %s1706_s9 = scalar_lea.vmem %s1705_s16, 4096  ;;  %p1707_p4 = scmp.lt.s32.totalorder %s1961_s10, %s1705_s16 }
  0x56   : > { %p1702_p2 = pnand %p1700_p12, %p1686_p0  ;;  %p1708_p13 = scmp.lt.s32.totalorder %s1706_s9, %s1699_s30 }
  0x58   : > { %p1703_p5 = pneg %p1702_p2  ;;  %p1709_p6 = por %p1708_p13, %p1707_p4 }
  0x5a   : > { %p1710_p10 = pnand %p1709_p6, %p1703_p5 }
  0x5c   : > { %1713 = shalt.err (!%p1710_p10)
}
  0x5d   : > { %s1791_s12 = smov 128   ;;  %s1792_s13 = smov 8  }
  0x5e   : > { %1417 = dma.hbm_to_vmem [thread:$0]  (!%p1963_p11), %s1959_s8, 2048, %s1961_s10, %s1967_s28, %s1791_s12, %s1791_s12, %s1792_s13  }
  0x5f   : > { %231 = sbr.rel (%p1866_p8) target bundleno = 686 (0x2ae), region = 40  ;;  %s1998_s29 = sand.u32 (!%p1866_p8), 1, %s1776_s19  }
  0x60   : > { %s1270_s17 = sshll.u32 (!%p1866_p8), %s1998_s29, 7  ;;  %s234_s7 = scalar_lea.sflag (!%p1866_p8), [#allocation3], %s1998_s29 }
  0x61   : > { %s2004_s6 = scalar_lea.vmem (!%p1866_p8), [#allocation2], %s1270_s17  ;;  %p2523_p4 = scmp.ne.s32.totalorder (!%p1866_p8), %s2516_s24, 0 }
  0x66   : > { %1759 = dma.done.wait (%p2523_p4), %s234_s7, 2048  }
  0x67   : > { %1761 = vsyncadd (%p2523_p4), %s234_s7, 4294965248  ;;  %p2524_p5 = scmp.eq.s32.totalorder %s1847_s22, 0 }
  0x69   : > { %1763 = dma.done.wait (%p2524_p5), [#allocation6], 2048   ;;  %p2525_p8 = pmov %p2524_p5 }
  0x6a   : > { %v1468_v0 = vld [vmem:[#allocation5] sm:$0xff]   ;;  %v1469_v1 = vld [vmem:[#allocation5 + $0x8] sm:$0xff]   ;;  %v1470_v2 = vld [vmem:[#allocation5 + $0x10] sm:$0xff]   ;;  %s2412_s11 = scalar_lea.vmem [#allocation8], %s1270_s17  ;;  %s1298_s28 = sshll.u32 %s1847_s22, 11 }
  0x6b   : > { %1765 = vsyncadd (%p2525_p8), [#allocation6], 4294965248  ;;  %1331 = vmatprep.subr.bf16.mxu0 %v1468_v0  ;;  %v1471_v3 = vld [vmem:[#allocation5 + $0x18] sm:$0xff]   ;;  %v2015_v4 = vld [vmem:[%s2004_s6] sm:$0xff]  ;;  %s1169_s30 = sshll.u32 %s2412_s11, 4  ;;  %s2457_s22 = scalar_lea.hbm %s2512_s5, %s1298_s28  ;;  %s2459_s30 = int_to_ptr.vmem [resolvable:$true] %s1169_s30 }
  0x6c   : > { %1332 = vmatpush3.bf16.msra.mxu0 %v1468_v0  ;;  %v2018_v5 = vld [vmem:[%s2004_s6 + $0x8] sm:$0xff]  ;;  %v2021_v6 = vld [vmem:[%s2004_s6 + $0x10] sm:$0xff]  ;;  %v307_v7 = vand.u32 2147483647, %v2015_v4  ;;  %v2026_v9 = vld [vmem:[%s2004_s6 + $0x18] sm:$0xff]  ;;  %v291_v49 = vmax.f32 %v2015_v4, 0.0 }
  0x6d   : > { %1333 = vmatprep.subr.bf16.mxu0 %v1469_v1  ;;  %v308_v8 = vand.u32 2147483647, %v2018_v5  ;;  %v309_v10 = vand.u32 2147483647, %v2021_v6  ;;  %v2030_v11 = vld [vmem:[%s2004_s6 + $0x20] sm:$0xff]  ;;  %v2034_v15 = vld [vmem:[%s2004_s6 + $0x28] sm:$0xff] }
  0x6e   : > { %v323_v12 = vsub.f32 0.0, %v307_v7  ;;  %v310_v14 = vand.u32 2147483647, %v2026_v9  ;;  %v1472_v16 = vld [vmem:[#allocation5 + $0x20] sm:$0xff]   ;;  %v311_v18 = vand.u32 2147483647, %v2030_v11 }
  0x6f   : > { %v324_v13 = vsub.f32 0.0, %v308_v8  ;;  %v325_v17 = vsub.f32 0.0, %v309_v10  ;;  %v2038_v19 = vld [vmem:[%s2004_s6 + $0x30] sm:$0xff]  ;;  %v2041_v20 = vld [vmem:[%s2004_s6 + $0x38] sm:$0xff]  ;;  %v312_v25 = vand.u32 2147483647, %v2034_v15 }
  0x70   : > { %1334 = vmatpush3.bf16.msra.mxu0 %v1469_v1  ;;  %v339_v21 = vmul.f32 1.442695, %v323_v12  ;;  %v326_v23 = vsub.f32 0.0, %v310_v14  ;;  %v327_v26 = vsub.f32 0.0, %v311_v18  ;;  %v313_v28 = vand.u32 2147483647, %v2038_v19 }
  0x71   : > { %1335 = vmatprep.subr.bf16.mxu0 %v1470_v2  ;;  %v341_v22 = vmul.f32 1.442695, %v324_v13  ;;  %v343_v24 = vmul.f32 1.442695, %v325_v17  ;;  %v314_v29 = vand.u32 2147483647, %v2041_v20 }
  0x72   : > { %1484 = vpow2.f32 %v339_v21  ;;  %v345_v27 = vmul.f32 1.442695, %v326_v23  ;;  %v1473_v30 = vld [vmem:[#allocation5 + $0x28] sm:$0xff]   ;;  %v328_v31 = vsub.f32 0.0, %v312_v25  ;;  %v347_v32 = vmul.f32 1.442695, %v327_v26 }
  0x73   : > { %1486 = vpow2.f32 %v341_v22  ;;  %v2047_v33 = vld [vmem:[%s2004_s6 + $0x40] sm:$0xff]  ;;  %v2050_v34 = vld [vmem:[%s2004_s6 + $0x48] sm:$0xff]  ;;  %v329_v35 = vsub.f32 0.0, %v313_v28  ;;  %v330_v36 = vsub.f32 0.0, %v314_v29  ;;  %v2054_v39 = vld [vmem:[%s2004_s6 + $0x50] sm:$0xff]  ;;  %v292_v52 = vmax.f32 %v2018_v5, 0.0 }
  0x74   : > { %1336 = vmatpush3.bf16.msra.mxu0 %v1470_v2  ;;  %1488 = vpow2.f32 %v343_v24  ;;  %v349_v37 = vmul.f32 1.442695, %v328_v31  ;;  %v315_v38 = vand.u32 2147483647, %v2047_v33  ;;  %v2057_v40 = vld [vmem:[%s2004_s6 + $0x58] sm:$0xff]  ;;  %v1474_v43 = vld [vmem:[#allocation5 + $0x30] sm:$0xff]  }
  0x75   : > { %1337 = vmatprep.subr.bf16.mxu0 %v1471_v3  ;;  %1490 = vpow2.f32 %v345_v27  ;;  %v351_v41 = vmul.f32 1.442695, %v329_v35  ;;  %v316_v42 = vand.u32 2147483647, %v2050_v34  ;;  %v353_v44 = vmul.f32 1.442695, %v330_v36 }
  0x76   : > { %1492 = vpow2.f32 %v347_v32  ;;  %v331_v45 = vsub.f32 0.0, %v315_v38  ;;  %v317_v47 = vand.u32 2147483647, %v2054_v39  ;;  %v318_v48 = vand.u32 2147483647, %v2057_v40  ;;  %v2064_v51 = vld [vmem:[%s2004_s6 + $0x60] sm:$0xff] }
  0x77   : > { %1494 = vpow2.f32 %v349_v37  ;;  %v332_v46 = vsub.f32 0.0, %v316_v42  ;;  %v293_v53 = vmax.f32 %v2021_v6, 0.0  ;;  %v2069_v56 = vld [vmem:[%s2004_s6 + $0x68] sm:$0xff]  ;;  %v1475_v57 = vld [vmem:[#allocation5 + $0x38] sm:$0xff]   ;;  %v294_v58 = vmax.f32 %v2026_v9, 0.0  ;;  %s1156_s9 = scalar_lea.sflag [#allocation4], %s1998_s29 }
  0x78   : > { %1338 = vmatpush3.bf16.msra.mxu0 %v1471_v3  ;;  %1496 = vpow2.f32 %v351_v41  ;;  %v355_v50 = vmul.f32 1.442695, %v331_v45  ;;  %v333_v55 = vsub.f32 0.0, %v317_v47  ;;  %v295_v59 = vmax.f32 %v2030_v11, 0.0  ;;  %s1714_s12 = scalar_lea.vmem %s2459_s30, 2048  ;;  %p2566_p0 = scmp.ne.s32.totalorder %s2521_s23, 0 }
  0x79   : > { %1339 = vmatprep.subr.bf16.mxu0 %v1472_v16  ;;  %v357_v54 = vmul.f32 1.442695, %v332_v46  ;;  %v296_v60 = vmax.f32 %v2034_v15, 0.0  ;;  %1498 = vpow2.f32 %v353_v44  ;;  %v297_v62 = vmax.f32 %v2038_v19, 0.0  ;;  %p1715_p11 = scmp.ne.s32.totalorder %s2459_s30, %s1714_s12  ;;  %s1793_s13 = smov [#allocation8]  }
  0x7a   : > { %1500 = vpow2.f32 %v355_v50  ;;  %v334_v63 = vsub.f32 0.0, %v318_v48  ;;  %v319_v0 = vand.u32 2147483647, %v2064_v51  ;;  %v320_v8 = vand.u32 2147483647, %v2069_v56  ;;  %s1718_s17 = sshll.u32 %s1793_s13, 4  ;;  %s1719_s17 = int_to_ptr.vmem [resolvable:$false] %s1718_s17 }
  0x7b   : > { %1502 = vpow2.f32 %v357_v54  ;;  %v359_v14 = vmul.f32 1.442695, %v333_v55  ;;  %v298_v21 = vmax.f32 %v2041_v20, 0.0  ;;  %v300_v20 = vmax.f32 %v2050_v34, 0.0  ;;  %p1716_p1 = pnand %p1715_p11, %p2566_p0  ;;  %s1720_s7 = scalar_lea.vmem %s1719_s17, 4096 }
  0x7c   : > { %1340 = vmatpush3.bf16.msra.mxu0 %v1472_v16  ;;  %v1485_v61 = vpop.eup %1484  ;;  %v2078_v24 = vmul.f32 1.442695, %v334_v63  ;;  %v2080_v25 = vsub.f32 0.0, %v319_v0  ;;  %v2101_v63 = vsub.f32 0.0, %v320_v8  ;;  %p1721_p7 = scmp.lt.s32.totalorder %s2459_s30, %s1719_s17  ;;  %p1722_p9 = scmp.lt.s32.totalorder %s1720_s7, %s1714_s12 }
  0x7d   : > { %1341 = vmatprep.subr.bf16.mxu0 %v1473_v30  ;;  %v1487_v1 = vpop.eup %1486  ;;  %v371_v2 = vadd.f32 1.0, %v1485_v61  ;;  %v374_v3 = vmul.f32 -0.5, %v1485_v61  ;;  %v377_v7 = vand.u32 2147483647, %v1485_v61  ;;  %p1717_p3 = pneg %p1716_p1 }
  0x7e   : > { %v1489_v10 = vpop.eup %1488  ;;  %v380_v12 = vadd.f32 1.0, %v1487_v1  ;;  %v383_v13 = vmul.f32 -0.5, %v1487_v1  ;;  %v386_v17 = vand.u32 2147483647, %v1487_v1  ;;  %p1723_p12 = por %p1722_p9, %p1721_p7 }
  0x7f   : > { %v1491_v16 = vpop.eup %1490  ;;  %1504 = vlog2.f32 %v371_v2  ;;  %v389_v18 = vadd.f32 1.0, %v1489_v10  ;;  %v392_v23 = vmul.f32 -0.5, %v1489_v10  ;;  %v375_v26 = vadd.f32 1.0, %v374_v3 }
  0x80   : > { %1342 = vmatpush3.bf16.msra.mxu0 %v1473_v30  ;;  %v1493_v22 = vpop.eup %1492  ;;  %1506 = vlog2.f32 %v380_v12  ;;  %vm2082_vm0 = vcmp.lt.f32.partialorder %v377_v7, 0.0004427343  ;;  %v398_v28 = vadd.f32 1.0, %v1491_v16  ;;  %v384_v30 = vadd.f32 1.0, %v383_v13  ;;  %p1724_p2 = pnand %p1723_p12, %p1717_p3 }
  0x81   : > { %1343 = vmatprep.subr.bf16.mxu0 %v1474_v43  ;;  %1508 = vlog2.f32 %v389_v18  ;;  %v1495_v29 = vpop.eup %1494  ;;  %v395_v31 = vand.u32 2147483647, %v1489_v10  ;;  %v401_v32 = vmul.f32 -0.5, %v1491_v16  ;;  %vm2088_vm1 = vcmp.lt.f32.partialorder %v386_v17, 0.0004427343 }
  0x82   : > { %1510 = vpow2.f32 %v359_v14  ;;  %v2086_v35 = vpop.eup %1496  ;;  %v407_v37 = vadd.f32 1.0, %v1493_v22  ;;  %v410_v38 = vmul.f32 -0.5, %v1493_v22  ;;  %v393_v41 = vadd.f32 1.0, %v392_v23 }
  0x83   : > { %1512 = vlog2.f32 %v398_v28  ;;  %v402_v42 = vadd.f32 1.0, %v401_v32  ;;  %v413_v44 = vand.u32 2147483647, %v1493_v22  ;;  %v2092_v45 = vpop.eup %1498  ;;  %v416_v47 = vadd.f32 1.0, %v1495_v29 }
  0x84   : > { %1344 = vmatpush3.bf16.msra.mxu0 %v1474_v43  ;;  %v404_v43 = vand.u32 2147483647, %v1491_v16  ;;  %1514 = vlog2.f32 %v407_v37  ;;  %v411_v46 = vadd.f32 1.0, %v410_v38  ;;  %v419_v48 = vmul.f32 -0.5, %v1495_v29  ;;  %v2094_v50 = vpop.eup %1500 }
  0x85   : > { %1345 = vmatprep.subr.bf16.mxu0 %v1475_v57  ;;  %vm2096_vm2 = vcmp.lt.f32.partialorder %v395_v31, 0.0004427343  ;;  %v422_v55 = vand.u32 2147483647, %v1495_v29  ;;  %v376_v0 = vmul.f32 %v1485_v61, %v375_v26  ;;  %v385_v2 = vmul.f32 %v1487_v1, %v384_v30  ;;  %v2104_v7 = vpop.eup %1502 }
  0x86   : > { %1516 = vlog2.f32 %v416_v47  ;;  %v428_v3 = vmul.f32 -0.5, %v2086_v35  ;;  %v394_v12 = vmul.f32 %v1489_v10, %v393_v41  ;;  %vm2106_vm3 = vcmp.lt.f32.partialorder %v404_v43, 0.0004427343 }
  0x87   : > { %v434_v14 = vadd.f32 1.0, %v2092_v45  ;;  %v403_v18 = vmul.f32 %v1491_v16, %v402_v42  ;;  %v412_v23 = vmul.f32 %v1493_v22, %v411_v46  ;;  %vm2111_vm4 = vcmp.lt.f32.partialorder %v413_v44, 0.0004427343 }
  0x88   : > { %1346 = vmatpush3.bf16.msra.mxu0 %v1475_v57  ;;  %v425_v57 = vadd.f32 1.0, %v2086_v35  ;;  %v420_v61 = vadd.f32 1.0, %v419_v48  ;;  %v431_v28 = vand.u32 2147483647, %v2086_v35  ;;  %v443_v10 = vadd.f32 1.0, %v2094_v50 }
  0x89   : > { %v1505_v17 = vpop.eup %1504  ;;  %vm2117_vm5 = vcmp.lt.f32.partialorder %v422_v55, 0.0004427343  ;;  %v429_v16 = vadd.f32 1.0, %v428_v3  ;;  %v437_v22 = vmul.f32 -0.5, %v2092_v45  ;;  %v446_v42 = vmul.f32 -0.5, %v2094_v50 }
  0x8a   : > { %1518 = vlog2.f32 %v425_v57  ;;  %v1507_v1 = vpop.eup %1506  ;;  %v373_v26 = vmul.f32 0.6931472, %v1505_v17  ;;  %v421_v47 = vmul.f32 %v1495_v29, %v420_v61  ;;  %v440_v48 = vand.u32 2147483647, %v2092_v45 }
  0x8b   : > { %1520 = vlog2.f32 %v434_v14  ;;  %v1509_v30 = vpop.eup %1508  ;;  %v382_v31 = vmul.f32 0.6931472, %v1507_v1  ;;  %vm2136_vm6 = vcmp.lt.f32.partialorder %v431_v28, 0.0004427343  ;;  %v438_v4 = vadd.f32 1.0, %v437_v22  ;;  %v2180_v22 = vld [vmem:[%s2004_s6 + $0x78] sm:$0xff] }
  0x8c   : > { %v2122_v37 = vpop.eup %1510  ;;  %v379_v38 = vsel %vm2082_vm0, %v376_v0, %v373_v26  ;;  %v391_v41 = vmul.f32 0.6931472, %v1509_v30  ;;  %1522 = vlog2.f32 %v443_v10  ;;  %v452_v29 = vadd.f32 1.0, %v2104_v7  ;;  %v2173_v30 = vld [vmem:[%s2004_s6 + $0x70] sm:$0xff] }
  0x8d   : > { %v1513_v43 = vpop.eup %1512  ;;  %v388_v44 = vsel %vm2088_vm1, %v385_v2, %v382_v31  ;;  %v515_v46 = vadd.f32 %v379_v38, %v291_v49  ;;  %v449_v49 = vand.u32 2147483647, %v2094_v50  ;;  %v447_v54 = vadd.f32 1.0, %v446_v42 }
  0x8e   : > { %v516_v55 = vadd.f32 %v388_v44, %v292_v52  ;;  %v397_v27 = vsel %vm2096_vm2, %v394_v12, %v391_v41  ;;  %v400_v57 = vmul.f32 0.6931472, %v1513_v43  ;;  %v1515_v3 = vpop.eup %1514  ;;  %v430_v17 = vmul.f32 %v2086_v35, %v429_v16 }
  0x8f   : > { %v517_v36 = vadd.f32 %v397_v27, %v293_v53  ;;  %v409_v52 = vmul.f32 0.6931472, %v1515_v3  ;;  %1524 = vlog2.f32 %v452_v29  ;;  %v455_v6 = vmul.f32 -0.5, %v2104_v7 }
  0x90   : > { %v531_v2 = vpack.c.bf16 %v516_v55, %v515_v46  ;;  %v406_v5 = vsel %vm2106_vm3, %v403_v18, %v400_v57  ;;  %v1517_v12 = vpop.eup %1516  ;;  %1526 = vpow2.f32 %v2078_v24  ;;  %v461_v13 = vadd.f32 1.0, %v2122_v37 }
  0x91   : > { %v518_v14 = vadd.f32 %v406_v5, %v294_v58  ;;  %v415_v61 = vsel %vm2111_vm4, %v412_v23, %v409_v52  ;;  %v418_v1 = vmul.f32 0.6931472, %v1517_v12  ;;  %v439_v35 = vmul.f32 %v2092_v45, %v438_v4 }
  0x92   : > { %1347 = vmatprep.mubr.bf16.mxu0 %v531_v2  ;;  %v519_v9 = vadd.f32 %v415_v61, %v295_v59  ;;  %vm2159_vm7 = vcmp.lt.f32.partialorder %v440_v48, 0.0004427343  ;;  %v448_v24 = vmul.f32 %v2094_v50, %v447_v54  ;;  %vm2164_vm8 = vcmp.lt.f32.partialorder %v449_v49, 0.0004427343 }
  0x93   : > { %v532_v18 = vpack.c.bf16 %v518_v14, %v517_v36  ;;  %v424_v28 = vsel %vm2117_vm5, %v421_v47, %v418_v1  ;;  %v456_v10 = vadd.f32 1.0, %v455_v6  ;;  %1528 = vlog2.f32 %v461_v13 }
  0x94   : > { %v1519_v53 = vpop.eup %1518  ;;  %v520_v11 = vadd.f32 %v424_v28, %v296_v60  ;;  %v363_v50 = vmul.f32 1.442695, %v2080_v25  ;;  %v365_v16 = vmul.f32 1.442695, %v2101_v63  ;;  %v458_v41 = vand.u32 2147483647, %v2104_v7 }
  0x95   : > { %v427_v58 = vmul.f32 0.6931472, %v1519_v53  ;;  %v1521_v26 = vpop.eup %1520  ;;  %1348 = vmatmul.mubr.bf16.vlgmr.msra.gmra.mrb[0].mxu0 %v532_v18  ;;  %v321_v19 = vand.u32 2147483647, %v2173_v30  ;;  %v322_v25 = vand.u32 2147483647, %v2180_v22  ;;  %v457_v44 = vmul.f32 %v2104_v7, %v456_v10 }
  0x96   : > { %v436_v45 = vmul.f32 0.6931472, %v1521_v26  ;;  %v1523_v31 = vpop.eup %1522  ;;  %v533_v15 = vpack.c.bf16 %v520_v11, %v519_v9  ;;  %1530 = vpow2.f32 %v363_v50  ;;  %vm459_vm9 = vcmp.lt.f32.partialorder %v458_v41, 0.0004427343 }
  0x97   : > { %v433_v59 = vsel %vm2136_vm6, %v430_v17, %v427_v58  ;;  %v445_v38 = vmul.f32 0.6931472, %v1523_v31  ;;  %1532 = vpow2.f32 %v365_v16  ;;  %v337_v46 = vsub.f32 0.0, %v321_v19  ;;  %v2212_v17 = vld [vmem:[%s2509_s2] ss:$0 sm:$0xff] }
  0x98   : > { %v521_v32 = vadd.f32 %v433_v59, %v297_v62  ;;  %v442_v60 = vsel %vm2159_vm7, %v439_v35, %v436_v45  ;;  %1351 = vmatprep.mubr.bf16.mxu0 %v533_v15  ;;  %v299_v62 = vmax.f32 %v2047_v33, 0.0  ;;  %v338_v48 = vsub.f32 0.0, %v322_v25 }
  0x99   : > { %v522_v42 = vadd.f32 %v442_v60, %v298_v21  ;;  %v451_v43 = vsel %vm2164_vm8, %v448_v24, %v445_v38  ;;  %v1525_v47 = vpop.eup %1524  ;;  %v464_v21 = vmul.f32 -0.5, %v2122_v37  ;;  %v367_v33 = vmul.f32 1.442695, %v337_v46 }
  0x9a   : > { %v1527_v55 = vpop.eup %1526  ;;  %v454_v27 = vmul.f32 0.6931472, %v1525_v47  ;;  %v523_v57 = vadd.f32 %v451_v43, %v299_v62  ;;  %v369_v3 = vmul.f32 1.442695, %v338_v48  ;;  %v467_v29 = vand.u32 2147483647, %v2122_v37 }
  0x9b   : > { %v534_v63 = vpack.c.bf16 %v522_v42, %v521_v32  ;;  %v470_v0 = vadd.f32 1.0, %v1527_v55  ;;  %1534 = vpow2.f32 %v367_v33  ;;  %v465_v49 = vadd.f32 1.0, %v464_v21 }
  0x9c   : > { %v460_v36 = vsel %vm459_vm9, %v457_v44, %v454_v27  ;;  %v473_v34 = vmul.f32 -0.5, %v1527_v55  ;;  %vm2197_vm10 = vcmp.lt.f32.partialorder %v467_v29, 0.0004427343  ;;  %v476_v61 = vand.u32 2147483647, %v1527_v55 }
  0x9d   : > { %1352 = vmatmul.mubr.bf16.gmra.mrb[4].mxu0 %v534_v63  ;;  %v524_v4 = vadd.f32 %v460_v36, %v300_v20  ;;  %1536 = vlog2.f32 %v470_v0  ;;  %v1529_v7 = vpop.eup %1528  ;;  %v466_v12 = vmul.f32 %v2122_v37, %v465_v49  ;;  %v301_v1 = vmax.f32 %v2054_v39, 0.0 }
  0x9e   : > { %1538 = vpow2.f32 %v369_v3  ;;  %v463_v54 = vmul.f32 0.6931472, %v1529_v7  ;;  %v474_v6 = vadd.f32 1.0, %v473_v34  ;;  %v302_v26 = vmax.f32 %v2057_v40, 0.0 }
  0x9f   : > { %v535_v2 = vpack.c.bf16 %v524_v4, %v523_v57  ;;  %vm477_vm11 = vcmp.lt.f32.partialorder %v476_v61, 0.0004427343  ;;  %v303_v40 = vmax.f32 %v2064_v51, 0.0  ;;  %v304_v19 = vmax.f32 %v2069_v56, 0.0 }
  0xa0   : > { %v1531_v5 = vpop.eup %1530  ;;  %v469_v18 = vsel %vm2197_vm10, %v466_v12, %v463_v54  ;;  %v475_v35 = vmul.f32 %v1527_v55, %v474_v6  ;;  %v305_v51 = vmax.f32 %v2173_v30, 0.0  ;;  %v306_v3 = vmax.f32 %v2180_v22, 0.0  ;;  %v1477_v30 = vld [vmem:[#allocation7 + $0x8] sm:$0xff]   ;;  %v1480_v22 = vld [vmem:[#allocation7 + $0x20] sm:$0xff]   ;;  %v1482_v12 = vld [vmem:[#allocation7 + $0x30] sm:$0xff]  }
  0xa1   : > { %v1533_v52 = vpop.eup %1532  ;;  %1355 = vmatprep.mubr.bf16.mxu0 %v535_v2  ;;  %v479_v14 = vadd.f32 1.0, %v1531_v5  ;;  %v482_v13 = vmul.f32 -0.5, %v1531_v5  ;;  %v525_v8 = vadd.f32 %v469_v18, %v301_v1  ;;  %v485_v59 = vand.u32 2147483647, %v1531_v5  ;;  %v1476_v2 = vld [vmem:[#allocation7] sm:$0xff]   ;;  %v1481_v54 = vld [vmem:[#allocation7 + $0x28] sm:$0xff]  }
  0xa2   : > { %v488_v53 = vadd.f32 1.0, %v1533_v52  ;;  %v491_v9 = vmul.f32 -0.5, %v1533_v52  ;;  %v494_v31 = vand.u32 2147483647, %v1533_v52  ;;  %1363 = vmatprep.subr.bf16.mxu1 %v1476_v2 }
  0xa3   : > { %1540 = vlog2.f32 %v479_v14  ;;  %v483_v11 = vadd.f32 1.0, %v482_v13  ;;  %vm486_vm12 = vcmp.lt.f32.partialorder %v485_v59, 0.0004427343  ;;  %1364 = vmatpush3.bf16.msra.mxu1 %v1476_v2  ;;  %v1483_v14 = vld [vmem:[#allocation7 + $0x38] sm:$0xff]  }
  0xa4   : > { %1542 = vlog2.f32 %v488_v53  ;;  %v492_v45 = vadd.f32 1.0, %v491_v9  ;;  %vm495_vm13 = vcmp.lt.f32.partialorder %v494_v31, 0.0004427343  ;;  %1365 = vmatprep.subr.bf16.mxu1 %v1477_v30 }
  0xa5   : > { %v1535_v58 = vpop.eup %1534  ;;  %v484_v16 = vmul.f32 %v1531_v5, %v483_v11  ;;  %v1478_v5 = vld [vmem:[#allocation7 + $0x10] sm:$0xff]  }
  0xa6   : > { %v497_v28 = vadd.f32 1.0, %v1535_v58  ;;  %v500_v32 = vmul.f32 -0.5, %v1535_v58  ;;  %v493_v41 = vmul.f32 %v1533_v52, %v492_v45  ;;  %v503_v43 = vand.u32 2147483647, %v1535_v58  ;;  %v1479_v52 = vld [vmem:[#allocation7 + $0x18] sm:$0xff]  }
  0xa7   : > { %v1537_v37 = vpop.eup %1536  ;;  %1366 = vmatpush3.bf16.msra.mxu1 %v1477_v30 }
  0xa8   : > { %v1539_v23 = vpop.eup %1538  ;;  %v472_v24 = vmul.f32 0.6931472, %v1537_v37  ;;  %1544 = vlog2.f32 %v497_v28  ;;  %v501_v25 = vadd.f32 1.0, %v500_v32  ;;  %vm504_vm14 = vcmp.lt.f32.partialorder %v503_v43, 0.0004427343  ;;  %1367 = vmatprep.subr.bf16.mxu1 %v1478_v5 }
  0xa9   : > { %v506_v39 = vadd.f32 1.0, %v1539_v23  ;;  %v509_v15 = vmul.f32 -0.5, %v1539_v23  ;;  %v512_v21 = vand.u32 2147483647, %v1539_v23 }
  0xaa   : > { %v478_v10 = vsel %vm477_vm11, %v475_v35, %v472_v24  ;;  %v502_v55 = vmul.f32 %v1535_v58, %v501_v25 }
  0xab   : > { %v526_v50 = vadd.f32 %v478_v10, %v302_v26  ;;  %1546 = vlog2.f32 %v506_v39  ;;  %v510_v46 = vadd.f32 1.0, %v509_v15  ;;  %vm513_vm15 = vcmp.lt.f32.partialorder %v512_v21, 0.0004427343  ;;  %1368 = vmatpush3.bf16.msra.mxu1 %v1478_v5 }
  0xac   : > { %1369 = vmatprep.subr.bf16.mxu1 %v1479_v52 }
  0xad   : > { %v1541_v60 = vpop.eup %1540  ;;  %v536_v38 = vpack.c.bf16 %v526_v50, %v525_v8  ;;  %v511_v56 = vmul.f32 %v1539_v23, %v510_v46 }
  0xae   : > { %v1543_v42 = vpop.eup %1542  ;;  %v481_v62 = vmul.f32 0.6931472, %v1541_v60 }
  0xaf   : > { %1356 = vmatmul.mubr.bf16.gmra.mrb[8].mxu0 %v536_v38  ;;  %v490_v63 = vmul.f32 0.6931472, %v1543_v42  ;;  %1370 = vmatpush3.bf16.msra.mxu1 %v1479_v52 }
  0xb0   : > { %v487_v44 = vsel %vm486_vm12, %v484_v16, %v481_v62  ;;  %1371 = vmatprep.subr.bf16.mxu1 %v1480_v22 }
  0xb1   : > { %v496_v47 = vsel %vm495_vm13, %v493_v41, %v490_v63  ;;  %v527_v20 = vadd.f32 %v487_v44, %v303_v40 }
  0xb2   : > { %v528_v48 = vadd.f32 %v496_v47, %v304_v19  ;;  %v1545_v27 = vpop.eup %1544 }
  0xb3   : > { %v499_v57 = vmul.f32 0.6931472, %v1545_v27  ;;  %1372 = vmatpush3.bf16.msra.mxu1 %v1480_v22 }
  0xb4   : > { %v537_v33 = vpack.c.bf16 %v528_v48, %v527_v20  ;;  %1373 = vmatprep.subr.bf16.mxu1 %v1481_v54 }
  0xb5   : > { %v1547_v0 = vpop.eup %1546  ;;  %v505_v36 = vsel %vm504_vm14, %v502_v55, %v499_v57 }
  0xb6   : > { %1359 = vmatprep.mubr.bf16.mxu0 %v537_v33  ;;  %v508_v4 = vmul.f32 0.6931472, %v1547_v0  ;;  %v529_v49 = vadd.f32 %v505_v36, %v305_v51 }
  0xb7   : > { %1374 = vmatpush3.bf16.msra.mxu1 %v1481_v54 }
  0xb8   : > { %v514_v7 = vsel %vm513_vm15, %v511_v56, %v508_v4  ;;  %1375 = vmatprep.subr.bf16.mxu1 %v1482_v12 }
  0xb9   : > { %v530_v29 = vadd.f32 %v514_v7, %v306_v3 }
  0xbb   : > { %v538_v34 = vpack.c.bf16 %v530_v29, %v529_v49  ;;  %1376 = vmatpush3.bf16.msra.mxu1 %v1482_v12 }
  0xbc   : > { %1377 = vmatprep.subr.bf16.mxu1 %v1483_v14 }
  0xbd   : > { %1360 = vmatmul.mubr.bf16.gmra.mrb[12].mxu0 %v538_v34 }
  0xbf   : > { %1378 = vmatpush3.bf16.msra.mxu1 %v1483_v14 }
 0x168   : > { %v1349_v6 = vpop.f32.mrb[0].mxu0 }
 0x169   : > { %v2215_v53 = vadd.f32 %v1349_v6, %v2212_v17  ;;  %v644_v61 = vpop.f32.mrb[1].mxu0 }
 0x16a   : > { %v2218_v1 = vadd.f32 %v2212_v17, %v644_v61  ;;  %v1350_v13 = vpop.f32.mrb[2].mxu0 }
 0x16b   : > { %v725_v18 = vand.u32 2147483647, %v2215_v53  ;;  %v2222_v9 = vadd.f32 %v1350_v13, %v2212_v17  ;;  %v647_v58 = vpop.f32.mrb[3].mxu0  ;;  %v709_v0 = vmax.f32 %v2215_v53, 0.0 }
 0x16c   : > { %v723_v35 = vand.u32 2147483647, %v2218_v1  ;;  %v2226_v37 = vadd.f32 %v2212_v17, %v647_v58  ;;  %v707_v36 = vmax.f32 %v2218_v1, 0.0 }
 0x16d   : > { %v741_v26 = vsub.f32 0.0, %v725_v18  ;;  %v726_v28 = vand.u32 2147483647, %v2222_v9  ;;  %v710_v7 = vmax.f32 %v2222_v9, 0.0 }
 0x16e   : > { %v739_v23 = vsub.f32 0.0, %v723_v35  ;;  %v724_v24 = vand.u32 2147483647, %v2226_v37  ;;  %v708_v30 = vmax.f32 %v2226_v37, 0.0 }
 0x16f   : > { %v759_v8 = vmul.f32 1.442695, %v741_v26  ;;  %v742_v11 = vsub.f32 0.0, %v726_v28 }
 0x170   : > { %v755_v59 = vmul.f32 1.442695, %v739_v23  ;;  %v740_v45 = vsub.f32 0.0, %v724_v24  ;;  %v1353_v39 = vpop.f32.mrb[4].mxu0 }
 0x171   : > { %1548 = vpow2.f32 %v759_v8  ;;  %v761_v10 = vmul.f32 1.442695, %v742_v11  ;;  %v2231_v31 = vadd.f32 %v1353_v39, %v2212_v17  ;;  %v660_v32 = vpop.f32.mrb[5].mxu0 }
 0x172   : > { %1550 = vpow2.f32 %v755_v59  ;;  %v757_v50 = vmul.f32 1.442695, %v740_v45  ;;  %v2234_v16 = vadd.f32 %v2212_v17, %v660_v32  ;;  %v1354_v15 = vpop.f32.mrb[6].mxu0 }
 0x173   : > { %1552 = vpow2.f32 %v761_v10  ;;  %v729_v60 = vand.u32 2147483647, %v2231_v31  ;;  %v2238_v38 = vadd.f32 %v1354_v15, %v2212_v17  ;;  %v663_v40 = vpop.f32.mrb[7].mxu0  ;;  %v713_v5 = vmax.f32 %v2231_v31, 0.0 }
 0x174   : > { %1554 = vpow2.f32 %v757_v50  ;;  %v727_v41 = vand.u32 2147483647, %v2234_v16  ;;  %v2242_v42 = vadd.f32 %v2212_v17, %v663_v40  ;;  %v711_v52 = vmax.f32 %v2234_v16, 0.0 }
 0x175   : > { %v745_v19 = vsub.f32 0.0, %v729_v60  ;;  %v730_v62 = vand.u32 2147483647, %v2238_v38  ;;  %v714_v12 = vmax.f32 %v2238_v38, 0.0 }
 0x176   : > { %v743_v25 = vsub.f32 0.0, %v727_v41  ;;  %v728_v63 = vand.u32 2147483647, %v2242_v42  ;;  %v712_v14 = vmax.f32 %v2242_v42, 0.0 }
 0x177   : > { %v767_v43 = vmul.f32 1.442695, %v745_v19  ;;  %v746_v44 = vsub.f32 0.0, %v730_v62 }
 0x178   : > { %v763_v46 = vmul.f32 1.442695, %v743_v25  ;;  %v744_v47 = vsub.f32 0.0, %v728_v63 }
 0x179   : > { %1556 = vpow2.f32 %v767_v43  ;;  %v769_v20 = vmul.f32 1.442695, %v746_v44 }
 0x17a   : > { %1558 = vpow2.f32 %v763_v46  ;;  %v765_v21 = vmul.f32 1.442695, %v744_v47 }
 0x17b   : > { %v1549_v48 = vpop.eup %1548  ;;  %1560 = vpow2.f32 %v769_v20 }
 0x17c   : > { %v2246_v55 = vpop.eup %1550  ;;  %v805_v27 = vadd.f32 1.0, %v1549_v48  ;;  %1562 = vpow2.f32 %v765_v21  ;;  %v808_v33 = vmul.f32 -0.5, %v1549_v48  ;;  %v811_v3 = vand.u32 2147483647, %v1549_v48 }
 0x17d   : > { %v1553_v51 = vpop.eup %1552  ;;  %v787_v4 = vadd.f32 1.0, %v2246_v55  ;;  %v790_v29 = vmul.f32 -0.5, %v2246_v55  ;;  %v793_v6 = vand.u32 2147483647, %v2246_v55 }
 0x17e   : > { %v2248_v57 = vpop.eup %1554  ;;  %1564 = vlog2.f32 %v805_v27  ;;  %v814_v56 = vadd.f32 1.0, %v1553_v51  ;;  %v809_v49 = vadd.f32 1.0, %v808_v33  ;;  %v817_v2 = vmul.f32 -0.5, %v1553_v51 }
 0x17f   : > { %v796_v34 = vadd.f32 1.0, %v2248_v57  ;;  %v820_v54 = vand.u32 2147483647, %v1553_v51  ;;  %vm2262_vm0 = vcmp.lt.f32.partialorder %v811_v3, 0.0004427343  ;;  %v791_v8 = vadd.f32 1.0, %v790_v29 }
 0x180   : > { %1566 = vlog2.f32 %v814_v56  ;;  %v810_v28 = vmul.f32 %v1549_v48, %v809_v49  ;;  %v818_v59 = vadd.f32 1.0, %v817_v2  ;;  %v799_v60 = vmul.f32 -0.5, %v2248_v57 }
 0x181   : > { %1568 = vlog2.f32 %v787_v4  ;;  %vm2266_vm1 = vcmp.lt.f32.partialorder %v820_v54, 0.0004427343  ;;  %v2275_v44 = vmul.f32 %v2246_v55, %v791_v8  ;;  %v802_v21 = vand.u32 2147483647, %v2248_v57 }
 0x182   : > { %v1357_v35 = vpop.f32.mrb[8].mxu0  ;;  %1570 = vlog2.f32 %v796_v34  ;;  %v819_v48 = vmul.f32 %v1553_v51, %v818_v59  ;;  %v800_v56 = vadd.f32 1.0, %v799_v60  ;;  %vm2307_vm5 = vcmp.lt.f32.partialorder %v793_v6, 0.0004427343 }
 0x183   : > { %v1557_v22 = vpop.eup %1556  ;;  %v676_v24 = vpop.f32.mrb[9].mxu0  ;;  %v2272_v62 = vadd.f32 %v1357_v35, %v2212_v17  ;;  %vm803_vm7 = vcmp.lt.f32.partialorder %v802_v21, 0.0004427343 }
 0x184   : > { %v1559_v61 = vpop.eup %1558  ;;  %v841_v18 = vadd.f32 1.0, %v1557_v22  ;;  %v844_v58 = vmul.f32 -0.5, %v1557_v22  ;;  %v1358_v10 = vpop.f32.mrb[10].mxu0  ;;  %v847_v63 = vand.u32 2147483647, %v1557_v22  ;;  %v2282_v29 = vadd.f32 %v2212_v17, %v676_v24 }
 0x185   : > { %v1561_v26 = vpop.eup %1560  ;;  %v823_v23 = vadd.f32 1.0, %v1559_v61  ;;  %v826_v45 = vmul.f32 -0.5, %v1559_v61  ;;  %v679_v15 = vpop.f32.mrb[11].mxu0  ;;  %v829_v43 = vand.u32 2147483647, %v1559_v61 }
 0x186   : > { %v1563_v11 = vpop.eup %1562  ;;  %1572 = vlog2.f32 %v841_v18  ;;  %v850_v39 = vadd.f32 1.0, %v1561_v26  ;;  %v853_v50 = vmul.f32 -0.5, %v1561_v26  ;;  %v845_v41 = vadd.f32 1.0, %v844_v58 }
 0x187   : > { %1574 = vlog2.f32 %v823_v23  ;;  %v832_v19 = vadd.f32 1.0, %v1563_v11  ;;  %v827_v47 = vadd.f32 1.0, %v826_v45  ;;  %v835_v20 = vmul.f32 -0.5, %v1563_v11 }
 0x188   : > { %v1565_v40 = vpop.eup %1564  ;;  %1576 = vlog2.f32 %v850_v39  ;;  %v854_v27 = vadd.f32 1.0, %v853_v50  ;;  %v856_v33 = vand.u32 2147483647, %v1561_v26  ;;  %v2278_v4 = vmul.f32 %v1557_v22, %v845_v41 }
 0x189   : > { %v807_v25 = vmul.f32 0.6931472, %v1565_v40  ;;  %1578 = vlog2.f32 %v832_v19  ;;  %v733_v49 = vand.u32 2147483647, %v2272_v62  ;;  %vm2286_vm2 = vcmp.lt.f32.partialorder %v847_v63, 0.0004427343 }
 0x18a   : > { %v1567_v46 = vpop.eup %1566  ;;  %vm2290_vm3 = vcmp.lt.f32.partialorder %v829_v43, 0.0004427343  ;;  %v838_v2 = vand.u32 2147483647, %v1563_v11  ;;  %v2295_v22 = vadd.f32 %v1358_v10, %v2212_v17  ;;  %v2298_v54 = vadd.f32 %v2212_v17, %v679_v15 }
 0x18b   : > { %v816_v3 = vmul.f32 0.6931472, %v1567_v46  ;;  %v813_v55 = vsel %vm2262_vm0, %v810_v28, %v807_v25  ;;  %v1569_v18 = vpop.eup %1568  ;;  %v828_v58 = vmul.f32 %v1559_v61, %v827_v47  ;;  %v836_v35 = vadd.f32 1.0, %v835_v20 }
 0x18c   : > { %v749_v13 = vsub.f32 0.0, %v733_v49  ;;  %v731_v28 = vand.u32 2147483647, %v2282_v29  ;;  %v1571_v23 = vpop.eup %1570  ;;  %v855_v24 = vmul.f32 %v1561_v26, %v854_v27  ;;  %vm2301_vm4 = vcmp.lt.f32.partialorder %v856_v33, 0.0004427343 }
 0x18d   : > { %v734_v59 = vand.u32 2147483647, %v2295_v22  ;;  %v732_v45 = vand.u32 2147483647, %v2298_v54  ;;  %v2313_v61 = vadd.f32 %v813_v55, %v709_v0  ;;  %v822_v26 = vsel %vm2266_vm1, %v819_v48, %v816_v3 }
 0x18e   : > { %v775_v50 = vmul.f32 1.442695, %v749_v13  ;;  %v747_v15 = vsub.f32 0.0, %v731_v28  ;;  %vm2317_vm6 = vcmp.lt.f32.partialorder %v838_v2, 0.0004427343  ;;  %v837_v43 = vmul.f32 %v1563_v11, %v836_v35 }
 0x18f   : > { %v750_v6 = vsub.f32 0.0, %v734_v59  ;;  %v748_v19 = vsub.f32 0.0, %v732_v45  ;;  %v934_v32 = vadd.f32 %v822_v26, %v710_v7  ;;  %v789_v3 = vmul.f32 0.6931472, %v1569_v18 }
 0x190   : > { %v1573_v10 = vpop.eup %1572  ;;  %1580 = vpow2.f32 %v775_v50  ;;  %v771_v53 = vmul.f32 1.442695, %v747_v15  ;;  %v1361_v0 = vpop.f32.mrb[12].mxu0  ;;  %v801_v49 = vmul.f32 %v2248_v57, %v800_v56  ;;  %v798_v9 = vmul.f32 0.6931472, %v1571_v23 }
 0x191   : > { %v1575_v60 = vpop.eup %1574  ;;  %v843_v40 = vmul.f32 0.6931472, %v1573_v10  ;;  %v777_v47 = vmul.f32 1.442695, %v750_v6  ;;  %v773_v20 = vmul.f32 1.442695, %v748_v19  ;;  %v2324_v27 = vadd.f32 %v1361_v0, %v2212_v17 }
 0x192   : > { %v1577_v25 = vpop.eup %1576  ;;  %v825_v63 = vmul.f32 0.6931472, %v1575_v60  ;;  %1582 = vpow2.f32 %v771_v53  ;;  %v692_v33 = vpop.f32.mrb[13].mxu0 }
 0x193   : > { %v852_v46 = vmul.f32 0.6931472, %v1577_v25  ;;  %v1579_v48 = vpop.eup %1578  ;;  %1584 = vpow2.f32 %v777_v47  ;;  %v1362_v2 = vpop.f32.mrb[14].mxu0  ;;  %v849_v7 = vsel %vm2286_vm2, %v2278_v4, %v843_v40  ;;  %v737_v13 = vand.u32 2147483647, %v2324_v27 }
 0x194   : > { %v834_v55 = vmul.f32 0.6931472, %v1579_v48  ;;  %v831_v35 = vsel %vm2290_vm3, %v828_v58, %v825_v63  ;;  %1586 = vpow2.f32 %v773_v20  ;;  %v695_v18 = vpop.f32.mrb[15].mxu0  ;;  %v2338_v28 = vadd.f32 %v2212_v17, %v692_v33 }
 0x195   : > { %v858_v11 = vsel %vm2301_vm4, %v855_v24, %v852_v46  ;;  %v2341_v24 = vadd.f32 %v1362_v2, %v2212_v17  ;;  %v2344_v23 = vadd.f32 %v2212_v17, %v695_v18  ;;  %v753_v51 = vsub.f32 0.0, %v737_v13 }
 0x196   : > { %v840_v56 = vsel %vm2317_vm6, %v837_v43, %v834_v55  ;;  %v938_v4 = vadd.f32 %v858_v11, %v714_v12  ;;  %v795_v58 = vsel %vm2307_vm5, %v2275_v44, %v789_v3  ;;  %v937_v8 = vadd.f32 %v849_v7, %v713_v5 }
 0x197   : > { %v936_v34 = vadd.f32 %v840_v56, %v712_v14  ;;  %v735_v59 = vand.u32 2147483647, %v2338_v28  ;;  %v738_v45 = vand.u32 2147483647, %v2341_v24  ;;  %v935_v17 = vadd.f32 %v831_v35, %v711_v52 }
 0x198   : > { %v783_v38 = vmul.f32 1.442695, %v753_v51  ;;  %v736_v42 = vand.u32 2147483647, %v2344_v23  ;;  %v804_v12 = vsel %vm803_vm7, %v801_v49, %v798_v9  ;;  %v931_v14 = vadd.f32 %v795_v58, %v707_v36 }
 0x199   : > { %v932_v31 = vadd.f32 %v804_v12, %v708_v30  ;;  %v948_v5 = vpack.c.bf16 %v934_v32, %v2313_v61  ;;  %v751_v39 = vsub.f32 0.0, %v735_v59  ;;  %v949_v57 = vpack.c.bf16 %v936_v34, %v935_v17 }
 0x19a   : > { %v1581_v44 = vpop.eup %1580  ;;  %1588 = vpow2.f32 %v783_v38  ;;  %v950_v21 = vpack.c.bf16 %v938_v4, %v937_v8  ;;  %v754_v16 = vsub.f32 0.0, %v738_v45  ;;  %v752_v26 = vsub.f32 0.0, %v736_v42 }
 0x19b   : > { %v877_v10 = vadd.f32 1.0, %v1581_v44  ;;  %v947_v50 = vpack.c.bf16 %v932_v31, %v931_v14  ;;  %v779_v40 = vmul.f32 1.442695, %v751_v39  ;;  %v880_v41 = vmul.f32 -0.5, %v1581_v44 }
 0x19c   : > { %v1583_v52 = vpop.eup %1582  ;;  %v785_v30 = vmul.f32 1.442695, %v754_v16  ;;  %v781_v61 = vmul.f32 1.442695, %v752_v26  ;;  %v883_v43 = vand.u32 2147483647, %v1581_v44 }
 0x19d   : > { %v1585_v15 = vpop.eup %1584  ;;  %1590 = vlog2.f32 %v877_v10  ;;  %v859_v60 = vadd.f32 1.0, %v1583_v52  ;;  %1379 = vmatprep.mubr.bf16.mxu1 %v947_v50  ;;  %v862_v6 = vmul.f32 -0.5, %v1583_v52  ;;  %v881_v32 = vadd.f32 1.0, %v880_v41 }
 0x19e   : > { %v1587_v1 = vpop.eup %1586  ;;  %v886_v36 = vadd.f32 1.0, %v1585_v15  ;;  %1380 = vmatmul.mubr.bf16.vlgmr.msra.gmra.mrb[0].mxu1 %v948_v5  ;;  %v889_v19 = vmul.f32 -0.5, %v1585_v15  ;;  %v865_v20 = vand.u32 2147483647, %v1583_v52  ;;  %v892_v48 = vand.u32 2147483647, %v1585_v15 }
 0x19f   : > { %1592 = vlog2.f32 %v859_v60  ;;  %v868_v37 = vadd.f32 1.0, %v1587_v1  ;;  %1383 = vmatprep.mubr.bf16.mxu1 %v949_v57  ;;  %v871_v63 = vmul.f32 -0.5, %v1587_v1  ;;  %v863_v46 = vadd.f32 1.0, %v862_v6 }
 0x1a0   : > { %1594 = vlog2.f32 %v886_v36  ;;  %v890_v47 = vadd.f32 1.0, %v889_v19  ;;  %v718_v49 = vmax.f32 %v2295_v22, 0.0  ;;  %v716_v11 = vmax.f32 %v2298_v54, 0.0 }
 0x1a1   : > { %1596 = vlog2.f32 %v868_v37  ;;  %v872_v33 = vadd.f32 1.0, %v871_v63  ;;  %v874_v55 = vand.u32 2147483647, %v1587_v1  ;;  %vm2372_vm8 = vcmp.lt.f32.partialorder %v883_v43, 0.0004427343 }
 0x1a2   : > { %1598 = vpow2.f32 %v779_v40  ;;  %v882_v18 = vmul.f32 %v1581_v44, %v881_v32  ;;  %v864_v56 = vmul.f32 %v1583_v52, %v863_v46  ;;  %v891_v34 = vmul.f32 %v1585_v15, %v890_v47 }
 0x1a3   : > { %1600 = vpow2.f32 %v785_v30  ;;  %vm2376_vm9 = vcmp.lt.f32.partialorder %v865_v20, 0.0004427343  ;;  %vm893_vm10 = vcmp.lt.f32.partialorder %v892_v48, 0.0004427343  ;;  %v873_v54 = vmul.f32 %v1587_v1, %v872_v33 }
 0x1a4   : > { %v2367_v25 = vpop.eup %1588  ;;  %1602 = vpow2.f32 %v781_v61  ;;  %vm875_vm11 = vcmp.lt.f32.partialorder %v874_v55, 0.0004427343  ;;  %v715_v12 = vmax.f32 %v2282_v29, 0.0  ;;  %v717_v5 = vmax.f32 %v2272_v62, 0.0 }
 0x1a5   : > { %v913_v53 = vadd.f32 1.0, %v2367_v25  ;;  %v916_v16 = vmul.f32 -0.5, %v2367_v25  ;;  %v919_v62 = vand.u32 2147483647, %v2367_v25  ;;  %v721_v6 = vmax.f32 %v2324_v27, 0.0 }
 0x1a6   : > { %1384 = vmatmul.mubr.bf16.gmra.mrb[4].mxu1 %v950_v21  ;;  %v722_v27 = vmax.f32 %v2341_v24, 0.0  ;;  %v720_v7 = vmax.f32 %v2344_v23, 0.0  ;;  %v2402_v24 = vld [vmem:[%s2511_s4] ss:$0 sm:$0xff] }
 0x1a7   : > { %v1591_v0 = vpop.eup %1590  ;;  %1604 = vlog2.f32 %v913_v53  ;;  %v917_v29 = vadd.f32 1.0, %v916_v16  ;;  %vm2390_vm12 = vcmp.lt.f32.partialorder %v919_v62, 0.0004427343  ;;  %v1619_v62 = vld [vmem:[%s2004_s6 + $0x28] sm:$0xff]  ;;  %v1621_v53 = vld [vmem:[%s2004_s6 + $0x40] sm:$0xff] }
 0x1a8   : > { %v879_v9 = vmul.f32 0.6931472, %v1591_v0 }
 0x1a9   : > { %v1593_v3 = vpop.eup %1592  ;;  %v918_v19 = vmul.f32 %v2367_v25, %v917_v29  ;;  %v1618_v29 = vld [vmem:[%s2004_s6 + $0x38] sm:$0xff] }
 0x1aa   : > { %v1595_v2 = vpop.eup %1594  ;;  %v861_v35 = vmul.f32 0.6931472, %v1593_v3  ;;  %v885_v42 = vsel %vm2372_vm8, %v882_v18, %v879_v9  ;;  %v719_v3 = vmax.f32 %v2338_v28, 0.0 }
 0x1ab   : > { %v1597_v13 = vpop.eup %1596  ;;  %v888_v4 = vmul.f32 0.6931472, %v1595_v2  ;;  %v941_v10 = vadd.f32 %v885_v42, %v717_v5  ;;  %v1614_v42 = vld [vmem:[%s2004_s6 + $0x18] sm:$0xff] }
 0x1ac   : > { %v1599_v51 = vpop.eup %1598  ;;  %v870_v22 = vmul.f32 0.6931472, %v1597_v13  ;;  %v867_v59 = vsel %vm2376_vm9, %v864_v56, %v861_v35 }
 0x1ad   : > { %v1601_v8 = vpop.eup %1600  ;;  %v894_v45 = vsel %vm893_vm10, %v891_v34, %v888_v4  ;;  %v895_v17 = vadd.f32 1.0, %v1599_v51  ;;  %v939_v57 = vadd.f32 %v867_v59, %v715_v12  ;;  %v898_v26 = vmul.f32 -0.5, %v1599_v51 }
 0x1ae   : > { %v1603_v38 = vpop.eup %1602  ;;  %v876_v14 = vsel %vm875_vm11, %v873_v54, %v870_v22  ;;  %v922_v31 = vadd.f32 1.0, %v1601_v8  ;;  %v942_v44 = vadd.f32 %v894_v45, %v718_v49  ;;  %v925_v50 = vmul.f32 -0.5, %v1601_v8  ;;  %v1612_v22 = vld [vmem:[%s2004_s6 + $0x10] sm:$0xff]  ;;  %v1613_v45 = vld [vmem:[%s2004_s6] sm:$0xff] }
 0x1af   : > { %v940_v39 = vadd.f32 %v876_v14, %v716_v11  ;;  %1606 = vlog2.f32 %v895_v17  ;;  %v904_v21 = vadd.f32 1.0, %v1603_v38  ;;  %v907_v1 = vmul.f32 -0.5, %v1603_v38  ;;  %v1615_v14 = vld [vmem:[%s2004_s6 + $0x8] sm:$0xff] }
 0x1b0   : > { %1608 = vlog2.f32 %v922_v31  ;;  %v952_v15 = vpack.c.bf16 %v942_v44, %v941_v10  ;;  %v899_v40 = vadd.f32 1.0, %v898_v26  ;;  %v926_v37 = vadd.f32 1.0, %v925_v50  ;;  %v1616_v10 = vld [vmem:[%s2004_s6 + $0x30] sm:$0xff]  ;;  %v1617_v50 = vld [vmem:[%s2004_s6 + $0x20] sm:$0xff] }
 0x1b1   : > { %1610 = vlog2.f32 %v904_v21  ;;  %v951_v52 = vpack.c.bf16 %v940_v39, %v939_v57  ;;  %v1605_v60 = vpop.eup %1604  ;;  %v901_v30 = vand.u32 2147483647, %v1599_v51  ;;  %v928_v61 = vand.u32 2147483647, %v1601_v8 }
 0x1b2   : > { %v915_v36 = vmul.f32 0.6931472, %v1605_v60  ;;  %v908_v63 = vadd.f32 1.0, %v907_v1  ;;  %v910_v32 = vand.u32 2147483647, %v1603_v38  ;;  %v900_v47 = vmul.f32 %v1599_v51, %v899_v40 }
 0x1b3   : > { %1387 = vmatprep.mubr.bf16.mxu1 %v951_v52  ;;  %v927_v48 = vmul.f32 %v1601_v8, %v926_v37  ;;  %vm902_vm13 = vcmp.lt.f32.partialorder %v901_v30, 0.0004427343  ;;  %vm929_vm14 = vcmp.lt.f32.partialorder %v928_v61, 0.0004427343 }
 0x1b4   : > { %1388 = vmatmul.mubr.bf16.gmra.mrb[8].mxu1 %v952_v15  ;;  %v921_v46 = vsel %vm2390_vm12, %v918_v19, %v915_v36  ;;  %v909_v55 = vmul.f32 %v1603_v38, %v908_v63  ;;  %vm911_vm15 = vcmp.lt.f32.partialorder %v910_v32, 0.0004427343 }
 0x1b5   : > { %v945_v2 = vadd.f32 %v921_v46, %v721_v6  ;;  %v1620_v6 = vld [vmem:[%s2004_s6 + $0x50] sm:$0xff]  ;;  %v1622_v46 = vld [vmem:[%s2004_s6 + $0x58] sm:$0xff] }
 0x1b9   : > { %v1607_v41 = vpop.eup %1606 }
 0x1ba   : > { %v1609_v43 = vpop.eup %1608  ;;  %v897_v0 = vmul.f32 0.6931472, %v1607_v41 }
 0x1bb   : > { %v924_v20 = vmul.f32 0.6931472, %v1609_v43  ;;  %v1611_v33 = vpop.eup %1610 }
 0x1bc   : > { %v903_v25 = vsel %vm902_vm13, %v900_v47, %v897_v0  ;;  %v906_v11 = vmul.f32 0.6931472, %v1611_v33 }
 0x1bd   : > { %v930_v49 = vsel %vm929_vm14, %v927_v48, %v924_v20  ;;  %v943_v13 = vadd.f32 %v903_v25, %v719_v3  ;;  %v1623_v20 = vld [vmem:[%s2004_s6 + $0x48] sm:$0xff] }
 0x1be   : > { %v946_v9 = vadd.f32 %v930_v49, %v722_v27  ;;  %v912_v35 = vsel %vm911_vm15, %v909_v55, %v906_v11  ;;  %v1624_v11 = vld [vmem:[%s2004_s6 + $0x70] sm:$0xff] }
 0x1bf   : > { %v944_v18 = vadd.f32 %v912_v35, %v720_v7  ;;  %v1625_v7 = vld [vmem:[%s2004_s6 + $0x60] sm:$0xff] }
 0x1c0   : > { %v954_v56 = vpack.c.bf16 %v946_v9, %v945_v2 }
 0x1c1   : > { %v953_v28 = vpack.c.bf16 %v944_v18, %v943_v13  ;;  %v1626_v18 = vld [vmem:[%s2004_s6 + $0x78] sm:$0xff] }
 0x1c3   : > { %1391 = vmatprep.mubr.bf16.mxu1 %v953_v28  ;;  %v1627_v28 = vld [vmem:[%s2004_s6 + $0x68] sm:$0xff] }
 0x1c4   : > { %1392 = vmatmul.mubr.bf16.gmra.mrb[12].mxu1 %v954_v56 }
 0x271   : > { %v1381_v4 = vpop.f32.mrb[0].mxu1 }
 0x272   : > { %v1069_v34 = vadd.f32 %v1381_v4, %v2402_v24  ;;  %v1060_v23 = vpop.f32.mrb[1].mxu1 }
 0x273   : > { %v1061_v51 = vadd.f32 %v2402_v24, %v1060_v23  ;;  %v1382_v58 = vpop.f32.mrb[2].mxu1 }
 0x274   : > { %v1125_v54 = vadd.f32 %v1612_v22, %v1069_v34  ;;  %v1072_v8 = vadd.f32 %v1382_v58, %v2402_v24  ;;  %v1063_v59 = vpop.f32.mrb[3].mxu1 }
 0x275   : > { %v1123_v17 = vadd.f32 %v1613_v45, %v1061_v51  ;;  %v1064_v38 = vadd.f32 %v2402_v24, %v1063_v59 }
 0x276   : > { %1141 = vst [vmem:[%s2412_s11 + $0x10] sm:$0xff] %v1125_v54  ;;  %v1126_v12 = vadd.f32 %v1614_v42, %v1072_v8 }
 0x277   : > { %1139 = vst [vmem:[%s2412_s11] sm:$0xff] %v1123_v17  ;;  %v1124_v31 = vadd.f32 %v1615_v14, %v1064_v38 }
 0x278   : > { %1142 = vst [vmem:[%s2412_s11 + $0x18] sm:$0xff] %v1126_v12 }
 0x279   : > { %1140 = vst [vmem:[%s2412_s11 + $0x8] sm:$0xff] %v1124_v31  ;;  %v1385_v5 = vpop.f32.mrb[4].mxu1 }
 0x27a   : > { %v1085_v44 = vadd.f32 %v1385_v5, %v2402_v24  ;;  %v1076_v39 = vpop.f32.mrb[5].mxu1 }
 0x27b   : > { %v1077_v57 = vadd.f32 %v2402_v24, %v1076_v39  ;;  %v1386_v21 = vpop.f32.mrb[6].mxu1 }
 0x27c   : > { %v1129_v16 = vadd.f32 %v1616_v10, %v1085_v44  ;;  %v1088_v52 = vadd.f32 %v1386_v21, %v2402_v24  ;;  %v1079_v26 = vpop.f32.mrb[7].mxu1 }
 0x27d   : > { %v1127_v15 = vadd.f32 %v1617_v50, %v1077_v57  ;;  %v1080_v60 = vadd.f32 %v2402_v24, %v1079_v26 }
 0x27e   : > { %1145 = vst [vmem:[%s2412_s11 + $0x30] sm:$0xff] %v1129_v16  ;;  %v1130_v1 = vadd.f32 %v1618_v29, %v1088_v52 }
 0x27f   : > { %1143 = vst [vmem:[%s2412_s11 + $0x20] sm:$0xff] %v1127_v15  ;;  %v1128_v36 = vadd.f32 %v1619_v62, %v1080_v60 }
 0x280   : > { %1146 = vst [vmem:[%s2412_s11 + $0x38] sm:$0xff] %v1130_v1 }
 0x281   : > { %1144 = vst [vmem:[%s2412_s11 + $0x28] sm:$0xff] %v1128_v36 }
 0x287   : > { %v1389_v40 = vpop.f32.mrb[8].mxu1 }
 0x288   : > { %v1101_v37 = vadd.f32 %v1389_v40, %v2402_v24  ;;  %v1092_v30 = vpop.f32.mrb[9].mxu1 }
 0x289   : > { %v1093_v61 = vadd.f32 %v2402_v24, %v1092_v30  ;;  %v1390_v41 = vpop.f32.mrb[10].mxu1 }
 0x28a   : > { %v1133_v19 = vadd.f32 %v1620_v6, %v1101_v37  ;;  %v1104_v63 = vadd.f32 %v1390_v41, %v2402_v24  ;;  %v1095_v43 = vpop.f32.mrb[11].mxu1 }
 0x28b   : > { %v1131_v0 = vadd.f32 %v1621_v53, %v1093_v61  ;;  %v1096_v32 = vadd.f32 %v2402_v24, %v1095_v43 }
 0x28c   : > { %1149 = vst [vmem:[%s2412_s11 + $0x50] sm:$0xff] %v1133_v19  ;;  %v1134_v47 = vadd.f32 %v1622_v46, %v1104_v63 }
 0x28d   : > { %1147 = vst [vmem:[%s2412_s11 + $0x40] sm:$0xff] %v1131_v0  ;;  %v1132_v48 = vadd.f32 %v1623_v20, %v1096_v32 }
 0x28e   : > { %1150 = vst [vmem:[%s2412_s11 + $0x58] sm:$0xff] %v1134_v47 }
 0x28f   : > { %1148 = vst [vmem:[%s2412_s11 + $0x48] sm:$0xff] %v1132_v48 }
 0x297   : > { %v1393_v33 = vpop.f32.mrb[12].mxu1 }
 0x298   : > { %v1117_v3 = vadd.f32 %v1393_v33, %v2402_v24  ;;  %v1108_v27 = vpop.f32.mrb[13].mxu1 }
 0x299   : > { %v1109_v25 = vadd.f32 %v2402_v24, %v1108_v27  ;;  %v1394_v49 = vpop.f32.mrb[14].mxu1 }
 0x29a   : > { %v1137_v55 = vadd.f32 %v1624_v11, %v1117_v3  ;;  %v1120_v2 = vadd.f32 %v1394_v49, %v2402_v24  ;;  %v1111_v9 = vpop.f32.mrb[15].mxu1 }
 0x29b   : > { %v1135_v35 = vadd.f32 %v1625_v7, %v1109_v25  ;;  %v1112_v13 = vadd.f32 %v2402_v24, %v1111_v9 }
 0x29c   : > { %1153 = vst [vmem:[%s2412_s11 + $0x70] sm:$0xff] %v1137_v55  ;;  %v1138_v56 = vadd.f32 %v1626_v18, %v1120_v2 }
 0x29d   : > { %1151 = vst [vmem:[%s2412_s11 + $0x60] sm:$0xff] %v1135_v35  ;;  %v1136_v4 = vadd.f32 %v1627_v28, %v1112_v13 }
 0x29e   : > { %1154 = vst [vmem:[%s2412_s11 + $0x78] sm:$0xff] %v1138_v56 }
 0x29f   : > { %1152 = vst [vmem:[%s2412_s11 + $0x68] sm:$0xff] %v1136_v4 }
 0x2a0   : > { %1727 = shalt.err (!%p1724_p2)
}
 0x2a1   : > { %s1728_s6 = scalar_lea.hbm %s2457_s22, 2048  ;;  %s1732_s8 = scalar_lea.hbm %s2512_s5, 4096 }
 0x2a2   : > { %p1729_p13 = scmp.ne.s32.totalorder %s2457_s22, %s1728_s6  ;;  %p1733_p4 = scmp.lt.u32.totalorder %s2457_s22, %s2512_s5 }
 0x2a3   : > { %p1734_p5 = scmp.lt.u32.totalorder %s1732_s8, %s1728_s6  ;;  %p1736_p11 = scmp.lt.u32.totalorder %s1728_s6, %s2457_s22 }
 0x2a4   : > { %p1730_p6 = pnand %p1729_p13, %p2566_p0 }
 0x2a5   : > { %p1735_p8 = por %p1734_p5, %p1733_p4 }
 0x2a6   : > { %p1731_p10 = pneg %p1730_p6 }
 0x2a7   : > { %p1737_p1 = por %p1736_p11, %p1735_p8 }
 0x2a9   : > { %p1738_p3 = pnand %p1737_p1, %p1731_p10 }
 0x2ab   : > { %1741 = shalt.err (!%p1738_p3)
}
 0x2ac   : > { %s1794_s28 = smov 128   ;;  %s1795_s15 = smov 8  }
 0x2ad   : > { %1405 = dma.vmem_to_hbm [thread:$0]  (%p2566_p0), %s2459_s30, 2048, %s2457_s22, %s1156_s9, %s1794_s28, %s1794_s28, %s1795_s15  }
 0x2ae PF: > { %s1184_s16 = sand.u32 1, %s1772_s18   ;;  %p2567_p7 = scmp.ne.s32.totalorder %s2517_s25, 0 }
 0x2af   : > { %p2568_p9 = scmp.ge.s32.totalorder %s1784_s21, 2  ;;  %s1185_s12 = scalar_lea.sflag [#allocation4], %s1184_s16 }
 0x2b1   : > { %p1419_p12 = pnand %p2568_p9, %p2567_p7 }
 0x2b3   : > { %1767 = dma.done.wait (!%p1419_p12), %s1185_s12, 2048  }
 0x2b4   : > { %1769 = vsyncadd (!%p1419_p12), %s1185_s12, 4294965248  ;;  %p19_p2 = scmp.ge.s32.totalorder %s1936_s14, 4   ;;  %s2569_s18 = smov %s1776_s19 }
 0x2b5   : > { %s2570_s19 = smov %s1780_s20  ;;  %s2571_s20 = smov %s1952_s27 }
 0x2b6   : > { %s2572_s21 = smov %s1936_s14  ;;  %21 = sbr.rel (!%p19_p2) target bundleno = 6 (0x6), region = 93 }
 0x2bd   :  { %1190 = vsyncpa [#allocation3], 1 }
 0x2be   :  { %1192 = vsyncpa [#allocation3 + $0x1], 1 }
 0x2bf   :  { %1193 = vsyncpa [#allocation6], 1 }
 0x2c0   :  { %1194 = vsyncpa [#allocation4], 1 }
 0x2c1   :  { %1196 = vsyncpa [#allocation4 + $0x1], 1 }

</bundles_post_ra>
